<compile_context>
chip_gen: v5e
topology: v5e:2x2
jax: 0.10.0
libtpu: 0.0.40
codegen_flags: <defaults>
</compile_context>

<pallas_src>
import functools

import jax
import jax.numpy as jnp
import numpy as np
from jax import lax
from jax.experimental import pallas as pl
from jax.experimental.pallas import tpu as pltpu


def _round_up(x, m):
    return (x + m - 1) // m * m


def _pick_tile_m(m, n_batch, max_tile):
    """Largest multiple-of-128 divisor of m that is <= max_tile (None if none).

    Prefers a tile that leaves >= 2 total grid steps so both v7x TensorCores
    get work even at batch 1.
    """
    divs = [t for t in range(128, min(m, max_tile) + 1, 128) if m % t == 0]
    if not divs:
        return None
    best = divs[-1]
    if n_batch * (m // best) < 2:
        smaller = [t for t in divs if m // t >= 2]
        if smaller:
            best = smaller[-1]
    return best


def _conv_bn_kernel(x_ref, w_ref, scale_ref, shift_ref, o_ref, *, precision):
    # x_ref:     (1, K, TILE_M)    im2col patches for one sample, M on lanes
    # w_ref:     (COUT, K)         conv weights, K = 9*Cin
    # scale_ref: (COUT, 1)         BN scale, f32
    # shift_ref: (COUT, 1)         BN shift, f32
    # o_ref:     (1, COUT, TILE_M) lane-dense output tile
    acc = jnp.dot(w_ref[...], x_ref[0],
                  preferred_element_type=jnp.float32, precision=precision)
    o_ref[0] = (acc * scale_ref[...] + shift_ref[...]).astype(o_ref.dtype)


def firstconv3x3_forward(x_nchw, weight_oihw, gamma, beta,
                         running_mean, running_var, *, stride, eps=1e-5,
                         compute_dtype=jnp.bfloat16, max_tile_m=2048):
    n, cin, h, w = x_nchw.shape
    cout = weight_oihw.shape[0]
    s = stride
    ho = (h + 2 - 3) // s + 1
    wo = (w + 2 - 3) // s + 1
    k_dim = 9 * cin
    m = ho * wo
    out_dtype = x_nchw.dtype

    compute_dtype = jnp.dtype(compute_dtype)
    # bf16 inputs -> single MXU pass; f32 inputs -> 3-pass HIGH (not HIGHEST).
    precision = (lax.Precision.HIGH if compute_dtype == jnp.float32
                 else lax.Precision.DEFAULT)

    # ---- inference-mode BN folded to per-channel scale/shift (f32 epilogue) ----
    scale_v = gamma.astype(jnp.float32) / jnp.sqrt(
        running_var.astype(jnp.float32) + eps)
    shift_v = beta.astype(jnp.float32) - running_mean.astype(jnp.float32) * scale_v
    scale = scale_v.reshape(cout, 1)
    shift = shift_v.reshape(cout, 1)

    # ---- transposed im2col: (N, 9*Cin, Ho*Wo), M on lanes, NCHW preserved ----
    xc = x_nchw.astype(compute_dtype)
    x_pad = jnp.pad(xc, ((0, 0), (0, 0), (1, 1), (1, 1)))
    taps = []
    for kh in range(3):
        for kw in range(3):
            taps.append(x_pad[:, :, kh:kh + s * ho:s, kw:kw + s * wo:s])
    x_cols = jnp.concatenate(taps, axis=1).reshape(n, k_dim, m)

    # weights: (Cout,Cin,3,3) -> (Cout, kh,kw,Cin) -> (Cout, 9*Cin)
    w_mat = jnp.transpose(weight_oihw, (0, 2, 3, 1)).reshape(cout, k_dim)
    w_mat = w_mat.astype(compute_dtype)

    # ---- choose the M tile ----
    tile_m = _pick_tile_m(m, n, max_tile_m)
    m_pad = m
    if tile_m is None:
        if m <= 8192:
            tile_m = m                      # full-dim lane block, no padding
        else:
            m_pad = _round_up(m, 128)       # rare fallback for large, odd M
            x_cols = jnp.pad(x_cols, ((0, 0), (0, 0), (0, m_pad - m)))
            tile_m = _pick_tile_m(m_pad, n, max_tile_m) or 128

    grid = (n, m_pad // tile_m)
    kernel = functools.partial(_conv_bn_kernel, precision=precision)

    itemsize_c = jnp.dtype(compute_dtype).itemsize
    cost = pl.CostEstimate(
        flops=2 * n * m_pad * k_dim * cout,
        transcendentals=0,
        bytes_accessed=(n * k_dim * m_pad * itemsize_c
                        + cout * k_dim * itemsize_c
                        + n * cout * m_pad * jnp.dtype(out_dtype).itemsize))

    out3 = pl.pallas_call(
        kernel,
        out_shape=jax.ShapeDtypeStruct((n, cout, m_pad), out_dtype),
        grid=grid,
        in_specs=[
            pl.BlockSpec((1, k_dim, tile_m), lambda i, j: (i, 0, j)),
            pl.BlockSpec((cout, k_dim), lambda i, j: (0, 0)),
            pl.BlockSpec((cout, 1), lambda i, j: (0, 0)),
            pl.BlockSpec((cout, 1), lambda i, j: (0, 0)),
        ],
        out_specs=pl.BlockSpec((1, cout, tile_m), lambda i, j: (i, 0, j)),
        compiler_params=pltpu.CompilerParams(
            dimension_semantics=("parallel", "parallel")),
        cost_estimate=cost,
    )(x_cols, w_mat, scale, shift)

    if m_pad != m:
        out3 = out3[:, :, :m]
    # free row-major split back to NCHW — no transpose / depad pass
    return out3.reshape(n, cout, ho, wo)


if __name__ == "__main__":
    key = jax.random.PRNGKey(0)
    k1, k2, k3, k4, k5, k6 = jax.random.split(key, 6)

    N, CIN, H, W = 2, 4, 16, 16
    COUT, STRIDE = 8, 2
    EPS = 1e-5

    # deterministic synthetic parameters (shapes per nn.Conv2d / nn.BatchNorm2d)
    x = jax.random.normal(k1, (N, CIN, H, W), jnp.float32)
    weight = 0.1 * jax.random.normal(k2, (COUT, CIN, 3, 3), jnp.float32)
    gamma = 1.0 + 0.1 * jax.random.normal(k3, (COUT,), jnp.float32)
    beta = 0.1 * jax.random.normal(k4, (COUT,), jnp.float32)
    running_mean = 0.1 * jax.random.normal(k5, (COUT,), jnp.float32)
    running_var = jnp.abs(jax.random.normal(k6, (COUT,), jnp.float32)) + 0.5

    out = firstconv3x3_forward(x, weight, gamma, beta, running_mean,
                               running_var, stride=STRIDE, eps=EPS)
    out = jax.block_until_ready(out)

    # pure-JAX reference (f32 conv + inference-mode BN)
    conv_ref = lax.conv_general_dilated(
        x, weight, (STRIDE, STRIDE), [(1, 1), (1, 1)],
        dimension_numbers=("NCHW", "OIHW", "NCHW"),
        precision=lax.Precision.HIGHEST)
    scale = gamma / jnp.sqrt(running_var + EPS)
    shift = beta - running_mean * scale
    ref = conv_ref * scale[None, :, None, None] + shift[None, :, None, None]

    # default path uses bf16 activations/weights (f32 accumulation + f32 BN
    # epilogue), so compare with a bf16-appropriate tolerance.
    np.testing.assert_allclose(np.asarray(out), np.asarray(ref),
                               rtol=5e-2, atol=5e-2)
    print("KERNEL_OK")
</pallas_src>

<mosaic_0001>
module attributes {stable_mosaic.version = 11 : i64} {
  func.func @_conv_bn_kernel(%arg0: i32, %arg1: i32, %arg2: memref<1x36x64xbf16, #tpu.memory_space<vmem>>, %arg3: memref<8x36xbf16, #tpu.memory_space<vmem>>, %arg4: memref<8x1xf32, #tpu.memory_space<vmem>>, %arg5: memref<8x1xf32, #tpu.memory_space<vmem>>, %arg6: memref<1x8x64xf32, #tpu.memory_space<vmem>>) attributes {dimension_semantics = [#tpu.dimension_semantics<parallel>, #tpu.dimension_semantics<parallel>], iteration_bounds = array<i64: 2, 1>, scalar_prefetch = 0 : i64, scratch_operands = 0 : i64, tpu.core_type = #tpu.core_type<tc>, window_params = [{transform_indices = @transform_0, window_bounds = array<i64: 1, 36, 64>}, {pipeline_mode = #tpu.pipeline_mode<synchronous>, transform_indices = @transform_1, window_bounds = array<i64: 8, 36>}, {pipeline_mode = #tpu.pipeline_mode<synchronous>, transform_indices = @transform_2, window_bounds = array<i64: 8, 1>}, {pipeline_mode = #tpu.pipeline_mode<synchronous>, transform_indices = @transform_3, window_bounds = array<i64: 8, 1>}, {transform_indices = @transform_4, window_bounds = array<i64: 1, 8, 64>}]} {
    %c0 = arith.constant 0 : index
    %c0_0 = arith.constant 0 : index
    %0 = vector.load %arg3[%c0, %c0_0] : memref<8x36xbf16, #tpu.memory_space<vmem>>, vector<8x36xbf16>
    %c0_1 = arith.constant 0 : index
    %c0_2 = arith.constant 0 : index
    %c0_3 = arith.constant 0 : index
    %1 = vector.load %arg2[%c0_1, %c0_2, %c0_3] : memref<1x36x64xbf16, #tpu.memory_space<vmem>>, vector<1x36x64xbf16>
    %2 = vector.shape_cast %1 : vector<1x36x64xbf16> to vector<36x64xbf16>
    %cst = arith.constant dense<0.000000e+00> : vector<8x64xf32>
    %3 = tpu.matmul %0, %2, %cst {dimension_numbers = #tpu.dot_dimension_numbers<[1], [0], [0], [1], [0, 0, 1, 1], [], []>} : vector<8x36xbf16>, vector<36x64xbf16>, vector<8x64xf32> -> vector<8x64xf32>
    %c0_4 = arith.constant 0 : index
    %c0_5 = arith.constant 0 : index
    %4 = vector.load %arg4[%c0_4, %c0_5] : memref<8x1xf32, #tpu.memory_space<vmem>>, vector<8x1xf32>
    %5 = vector.broadcast %4 : vector<8x1xf32> to vector<8x64xf32>
    %6 = arith.mulf %3, %5 : vector<8x64xf32>
    %c0_6 = arith.constant 0 : index
    %c0_7 = arith.constant 0 : index
    %7 = vector.load %arg5[%c0_6, %c0_7] : memref<8x1xf32, #tpu.memory_space<vmem>>, vector<8x1xf32>
    %8 = vector.broadcast %7 : vector<8x1xf32> to vector<8x64xf32>
    %9 = arith.addf %6, %8 : vector<8x64xf32>
    %c0_8 = arith.constant 0 : index
    %c0_9 = arith.constant 0 : index
    %c0_10 = arith.constant 0 : index
    %10 = vector.load %arg6[%c0_8, %c0_9, %c0_10] : memref<1x8x64xf32, #tpu.memory_space<vmem>>, vector<1x8x64xf32>
    %11 = vector.shape_cast %10 : vector<1x8x64xf32> to vector<8x64xf32>
    %12 = vector.shape_cast %9 : vector<8x64xf32> to vector<1x8x64xf32>
    tpu.vector_store %arg6[%c0_8, %c0_9, %c0_10], %12 {strides = array<i32>} : memref<1x8x64xf32, #tpu.memory_space<vmem>>, vector<1x8x64xf32>,
    return
  }
  func.func @transform_0(%arg0: i32, %arg1: i32) -> (i32, i32, i32) {
    %c0_i32 = arith.constant 0 : i32
    %c0_i32_0 = arith.constant 0 : i32
    return %arg0, %c0_i32, %arg1 : i32, i32, i32
  }
  func.func @transform_1(%arg0: i32, %arg1: i32) -> (i32, i32) {
    %c0_i32 = arith.constant 0 : i32
    %c0_i32_0 = arith.constant 0 : i32
    %c0_i32_1 = arith.constant 0 : i32
    return %c0_i32, %c0_i32_0 : i32, i32
  }
  func.func @transform_2(%arg0: i32, %arg1: i32) -> (i32, i32) {
    %c0_i32 = arith.constant 0 : i32
    %c0_i32_0 = arith.constant 0 : i32
    %c0_i32_1 = arith.constant 0 : i32
    return %c0_i32, %c0_i32_0 : i32, i32
  }
  func.func @transform_3(%arg0: i32, %arg1: i32) -> (i32, i32) {
    %c0_i32 = arith.constant 0 : i32
    %c0_i32_0 = arith.constant 0 : i32
    %c0_i32_1 = arith.constant 0 : i32
    return %c0_i32, %c0_i32_0 : i32, i32
  }
  func.func @transform_4(%arg0: i32, %arg1: i32) -> (i32, i32, i32) {
    %c0_i32 = arith.constant 0 : i32
    %c0_i32_0 = arith.constant 0 : i32
    return %arg0, %c0_i32, %arg1 : i32, i32, i32
  }
}

</mosaic_0001>

<bundles_post_ra>
// kernel: tpu_custom_call.1
= control target key start
LH: loop header
LB: loop body
LE: loop exit
PB: predicated region body
PF: predicated region fallthrough
CT: control target
= control target key end

     0   :  { %9 = vsyncpa [#allocation3], 0  ;;  %s663_s0 = inlined_call_operand.vmem [shape: bf16[2,36,64], index: 0, kind: input, shape index: {}]   ;;  %s664_s1 = inlined_call_operand.vmem [shape: bf16[8,36], index: 1, kind: input, shape index: {}]   ;;  %s665_s2 = inlined_call_operand.vmem [shape: f32[8,1], index: 2, kind: input, shape index: {}]   ;;  %s666_s3 = inlined_call_operand.vmem [shape: f32[8,1], index: 3, kind: input, shape index: {}]   ;;  %s667_s4 = inlined_call_operand.hbm [shape: f32[2,8,64], index: 4, kind: output, shape index: {}]  }
   0x1   :  { %11 = vsyncpa [#allocation3 + $0x1], 0  ;;  %s557_s15 = smov 0   ;;  %s559_s16 = smov 0  }
   0x2   :  { %s561_s17 = smov 0   ;;  %s563_s18 = smov 0  }
   0x3   :  { %s565_s19 = smov 0   ;;  %s567_s20 = smov 0  }
   0x4 LB: > { %s371_s21 = sadd.s32 4294967295, %s529_s20   ;;  %s372_s22 = sadd.s32 4294967294, %s529_s20   ;;  %s529_s20 = sphi %s567_s20, %s17_s20   ;;  %s525_s19 = sphi %s565_s19, %s674_s19   ;;  %s521_s18 = sphi %s563_s18, %s673_s18   ;;  %s517_s17 = sphi %s561_s17, %s672_s17   ;;  %s513_s16 = sphi %s559_s16, %s671_s16   ;;  %s509_s15 = sphi %s557_s15, %s670_s15  }
   0x5   : > { %s29_s23 = sadd.s32 1, %s525_s19  ;;  %s129_s24 = sadd.s32 1, %s517_s17 }
   0x6   : > { %p31_p0 = scmp.ge.s32.totalorder %s29_s23, 2  ;;  %p139_p1 = scmp.ne.s32.totalorder %s517_s17, %s513_s16 }
   0x7   : > { %p140_p2 = scmp.eq.s32.totalorder %s371_s21, 1  ;;  %p145_p3 = scmp.ne.s32.totalorder %s513_s16, %s509_s15 }
   0x8   : > { %s676_s23 = smov (%p31_p0, %s29_s23), 0  ;;  %p146_p5 = scmp.eq.s32.totalorder %s372_s22, 1 }
   0x9   : > { %p597_p4 = por %p140_p2, %p139_p1  ;;  %s124_s26 = ssub.s32 %s525_s19, %s676_s23 }
   0xa   : > { %p375_p6 = scmp.ge.s32.totalorder %s529_s20, 1  ;;  %p127_p7 = scmp.eq.s32.totalorder %s124_s26, 0 }
   0xb   : > { %p604_p8 = por %p146_p5, %p145_p3  ;;  %p184_p9 = scmp.lt.s32.totalorder %s529_s20, 3 }
   0xc   : > { %s610_s28 = scalar_select %p127_p7, %s517_s17, %s129_s24  }
   0xd   : > { %p185_p10 = pnand %p375_p6, %p184_p9 }
   0xe   : > { %p213_p11 = scmp.lt.s32.totalorder (!%p185_p10), %s521_s18, 1  ;;  %s210_s14 = sand.u32 (!%p185_p10), 1, %s513_s16  }
   0xf   : > { %188 = sbr.rel (%p185_p10) target bundleno = 176 (0xb0), region = 36  ;;  %s376_s21 = sshll.u32 (!%p185_p10), %s210_s14, 3 }
  0x10   : > { %s388_s22 = sshll.u32 (!%p185_p10), %s521_s18, 3  ;;  %s212_s30 = scalar_lea.vmem (!%p185_p10), [#allocation2], %s376_s21 }
  0x11   : > { %s292_s29 = scalar_lea.hbm (!%p185_p10), %s667_s4, %s388_s22  ;;  %s281_s7 = scalar_lea.sflag (!%p185_p10), [#allocation3], %s210_s14 }
  0x12   : > { %s471_s11 = scalar_lea.hbm (!%p185_p10), %s667_s4, 16 }
  0x14   : > { %v264_v0 = vld [vmem:[%s665_s2] sm:$0xff]  ;;  %v531_v1 = vmov 0   ;;  %s214_s5 = scalar_select %p213_p11, %s521_s18, 1  ;;  %vm247_vm0 = vcmask 1041408   ;;  %vm243_vm1 = vcmask 293888   ;;  %vm278_vm2 = vcmask 523264  }
  0x15   : > { %450 = vset.pattern.permute.xlu0 %v531_v1  ;;  %v271_v3 = vld [vmem:[%s666_s3] sm:$0xff] }
  0x16   : > { %267 = vperm.xlu0 %450, %v264_v0   ;;  %s393_s6 = smul.u32 20, %s214_s5  ;;  %v222_v9 = vld [vmem:[%s664_s1] sm:$0xf]  ;;  %s294_s5 = sshll.u32 %s212_s30, 4  ;;  %s295_s5 = int_to_ptr.vmem [resolvable:$true] %s294_s5 }
  0x18   : > { %s220_s9 = scalar_lea.vmem %s663_s0, %s393_s6  ;;  %s296_s6 = sshll.u32 %s292_s29, 4  ;;  %s297_s6 = int_to_ptr.hbm [resolvable:$true] %s296_s6 }
  0x19   : > { %v227_v2 = vld [vmem:[%s220_s9 + $0x10] sm:$0x3]  ;;  %v392_v7 = vld [vmem:[%s220_s9 + $0x8] sm:$0xff]  ;;  %v391_v8 = vld [vmem:[%s220_s9] sm:$0xff]  ;;  %s465_s8 = sshra.s32 %s297_s6, 4  ;;  %s466_s8 = int_to_ptr.hbm [resolvable:$true] %s465_s8 }
  0x1a   : > { %v237_v4 = vunpack.c.l.b16 %v227_v2  ;;  %s467_s18 = scalar_lea.hbm %s466_s8, 8  ;;  %p472_p1 = scmp.lt.s32.totalorder %s466_s8, %s667_s4 }
  0x1b   : > { %p468_p12 = scmp.ne.s32.totalorder %s466_s8, %s467_s18  ;;  %p473_p2 = scmp.lt.s32.totalorder %s471_s11, %s467_s18 }
  0x1c   : > { %v240_v5 = vpack.c.b16 %v237_v4, %v237_v4 }
  0x1d   : > { %p469_p13 = pnand %p468_p12, %p597_p4  ;;  %p474_p3 = por %p473_p2, %p472_p1 }
  0x1e   : > { %274 = vperm.xlu0 %450, %v271_v3   ;;  %v249_v6 = vsel %vm247_vm0, %v240_v5, 0 }
  0x1f   : > { %256 = vmatpush.bf16.msra.mxu0 %v249_v6  ;;  %p470_p0 = pneg %p469_p13 }
  0x21   : > { %p475_p5 = pnand %p474_p3, %p470_p0 }
  0x23   : > { %257 = vmatpush.bf16.msra.mxu0 %v392_v7 }
  0x27   : > { %258 = vmatpush.bf16.msra.mxu0 %v391_v8 }
  0x2a   : > { %386 = vmatmul.msk.bf16.vlgmr.msra.gmra.mxu0 %vm243_vm1, %v222_v9 }
  0x88   : > { %v268_v10 = vpop.permute.xlu0 %267 }
  0x90   : > { %v275_v13 = vpop.permute.xlu0 %274 }
  0xa7   : > { %v260_v11 = vpop.f32.mrf.mxu0 }
  0xa8   : > { %v270_v12 = vmul.f32 %v268_v10, %v260_v11 }
  0xaa   : > { %v277_v14 = vadd.f32 %v275_v13, %v270_v12 }
  0xac   : > { %279 = vst.msk [vmem:[%s212_s30] sm:$0xff] %vm278_vm2, %v277_v14 }
  0xad   : > { %478 = shalt.err (!%p475_p5)
}
  0xae   : > { %394 = dma.vmem_to_hbm [thread:$0]  (%p597_p4), %s295_s5, 128, %s297_s6, %s281_s7  }
  0xaf   : > { %v262_v15 = vpop.f32.mrf.mxu0 }
  0xb0 PF: > { %p400_p6 = scmp.ge.s32.totalorder %s529_s20, 2  ;;  %s308_s14 = sand.u32 1, %s509_s15  }
  0xb1   : > { %s309_s21 = scalar_lea.sflag [#allocation3], %s308_s14 }
  0xb2   : > { %p397_p7 = pnand %p400_p6, %p604_p8 }
  0xb4   : > { %p398_p9 = pneg %p397_p7 }
  0xb6   : > { %504 = dma.done.wait (%p398_p9), %s309_s21, 128  }
  0xb7   : > { %506 = vsyncadd (%p398_p9), %s309_s21, 4294967168  ;;  %s17_s20 = sadd.s32 1, %s529_s20   ;;  %s670_s15 = smov %s513_s16 }
  0xb8   : > { %p14_p10 = scmp.ge.s32.totalorder %s17_s20, 4   ;;  %s671_s16 = smov %s517_s17 }
  0xb9   : > { %s672_s17 = smov %s610_s28  ;;  %s673_s18 = smov %s525_s19 }
  0xba   : > { %s674_s19 = smov %s676_s23  ;;  %16 = sbr.rel (!%p14_p10) target bundleno = 4 (0x4), region = 71 }
  0xbf   :  { %315 = vsyncpa [#allocation3], 1 }
  0xc0   :  { %317 = vsyncpa [#allocation3 + $0x1], 1 }

</bundles_post_ra>
